<compile_context>
chip_gen: v7x
topology: tpu7x:2x2x1
jax: 0.10.0
libtpu: 0.0.40
codegen_flags: <defaults>
</compile_context>

<pallas_src>
import functools

import jax
import jax.numpy as jnp
import numpy as np
from jax import lax
from jax.experimental import pallas as pl
from jax.experimental.pallas import tpu as pltpu

MAX_ACTION = 0.5
HID = 128
N_SLOTS = 11          # 4 p-branches + 3 h-branches + 4 m-branches
C1, C2 = 32, 16       # conv1 / policy_conv1 output channels
BN_EPS = 1e-5


def _round_up(x, m):
    return ((x + m - 1) // m) * m


def actor_kernel(x_ref, w0_ref, b0_ref, mask_ref,
                 wc1_ref, g1_ref, be1_ref,
                 wc2_ref, g2_ref, be2_ref,
                 wa_ref, ba_ref,
                 out_ref, *, inv_n):
    # --- all 11 Linear+ReLU branches as ONE matmul on the packed slab.
    #     Padding rows have x == 0 and b0 == 0, so they stay exactly 0.
    f = jnp.dot(x_ref[...], w0_ref[...], preferred_element_type=jnp.float32)
    f = jnp.maximum(f + b0_ref[...], 0.0)                       # (R, 128)

    # --- conv1 (kernel_size=1): one (R,128)@(128,32) matmul (bias dropped —
    #     it cancels in training-mode BN).  Padding rows remain 0.
    z = jnp.dot(f, wc1_ref[...], preferred_element_type=jnp.float32)

    # --- BatchNorm1d(32), one-pass batch stats over the true n rows,
    #     then affine + ReLU; re-zero padding rows for the next stage.
    m1 = jnp.sum(z, axis=0, keepdims=True) * inv_n
    v1 = jnp.maximum(jnp.sum(z * z, axis=0, keepdims=True) * inv_n - m1 * m1, 0.0)
    z = jnp.maximum((z - m1) * lax.rsqrt(v1 + BN_EPS) * g1_ref[...]
                    + be1_ref[...], 0.0)
    z = z * mask_ref[...]                                       # (R, 32)

    # --- policy_conv1 (kernel_size=1): one (R,32)@(32,16) matmul (bias dropped)
    y = jnp.dot(z, wc2_ref[...], preferred_element_type=jnp.float32)

    # --- BatchNorm1d(16) one-pass stats + ReLU
    m2 = jnp.sum(y, axis=0, keepdims=True) * inv_n
    v2 = jnp.maximum(jnp.sum(y * y, axis=0, keepdims=True) * inv_n - m2 * m2, 0.0)
    y = jnp.maximum((y - m2) * lax.rsqrt(v2 + BN_EPS) * g2_ref[...]
                    + be2_ref[...], 0.0)                        # (R, 16)

    # --- action head: out[b] = sum_l y[l*Bpad+b] @ wa[l].
    #     Bpad is a multiple of 8, so the reshape is an 8-aligned sublane
    #     split (no relayout); one batched contraction + one slot reduction.
    bpad = out_ref.shape[0]
    y3 = y.reshape(N_SLOTS, bpad, y.shape[-1])                  # (11, Bpad, 16)
    acts = jnp.einsum("lbc,lca->lba", y3, wa_ref[...],
                      preferred_element_type=jnp.float32)       # (11, Bpad, Apad)
    out_ref[...] = jnp.tanh(jnp.sum(acts, axis=0) + ba_ref[...]) * MAX_ACTION


def prepare_actor_params(params, batch_size):
    """One-time packing of params (hoisted out of the per-call path)."""
    B = int(batch_size)
    Bpad = _round_up(max(B, 1), 8)
    Sp = params["wp"].shape[1]
    Sh = params["wh"].shape[1]
    Sm = params["wm"].shape[1]
    K = 4 * Sp + 3 * Sh + 4 * Sm
    Kpad = _round_up(K, 128)
    A = params["wa"].shape[-1]
    Apad = _round_up(A, 128)
    R = N_SLOTS * Bpad

    # Slot order matches the PyTorch cat: p1..p4, h1..h3, m1..m4.
    slot_w = ([params["wp"][i] for i in range(4)]
              + [params["wh"][i] for i in range(3)]
              + [params["wm"][i] for i in range(4)])
    w0 = jnp.concatenate(slot_w, axis=0)
    w0 = jnp.pad(w0, ((0, Kpad - K), (0, 0)))                   # (Kpad, 128)

    # Per-row bias slab (row l*Bpad + b); zero on batch-padding rows so they
    # propagate as exact zeros through the matmuls.
    slot_b = jnp.concatenate([params["bp"], params["bh"], params["bm"]],
                             axis=0)                            # (11, 128)
    rowmask = (jnp.arange(R) % Bpad < B).astype(jnp.float32)[:, None]  # (R, 1)
    b0 = jnp.repeat(slot_b, Bpad, axis=0) * rowmask             # (R, 128)

    # Action head weights padded to a 128-lane output slab.
    # wa[l, c, a]  <->  PyTorch action.weight[a, c*11 + l].
    wa = jnp.pad(params["wa"], ((0, 0), (0, 0), (0, Apad - A)))  # (11,16,Apad)
    ba = jnp.pad(params["ba"], ((0, 0), (0, Apad - A)))          # (1, Apad)

    return {
        "w0": w0, "b0": b0, "rowmask": rowmask,
        "wc1": params["wc1"], "g1": params["g1"], "be1": params["be1"],
        "wc2": params["wc2"], "g2": params["g2"], "be2": params["be2"],
        "wa": wa, "ba": ba,
    }


@functools.partial(jax.jit, static_argnames=("num_action",))
def actor_forward(prep, states_p, states_m, states_h, *, num_action):
    B = states_p.shape[0]
    Bpad = prep["b0"].shape[0] // N_SLOTS
    Sp, Sm, Sh = states_p.shape[-1], states_m.shape[-1], states_h.shape[-1]
    Kpad = prep["w0"].shape[0]
    Apad = prep["wa"].shape[-1]
    R = N_SLOTS * Bpad

    # Per-call work: only the packed input slab (row l*Bpad + b holds slot l's
    # features in its own K-segment; batch-padding rows are zero).
    slot_states = ([states_p[:, i, :] for i in range(4)]
                   + [states_h[:, i, :] for i in range(3)]
                   + [states_m[:, i, :] for i in range(4)])
    sizes = [Sp] * 4 + [Sh] * 3 + [Sm] * 4
    offs = np.cumsum([0] + sizes)                               # static ints
    x_blocks = []
    for l, xs in enumerate(slot_states):
        left, right = int(offs[l]), int(Kpad - offs[l + 1])
        x_blocks.append(jnp.pad(xs, ((0, Bpad - B), (left, right))))
    x_slab = jnp.concatenate(x_blocks, axis=0)                  # (R, Kpad)

    args = (x_slab, prep["w0"], prep["b0"], prep["rowmask"],
            prep["wc1"], prep["g1"], prep["be1"],
            prep["wc2"], prep["g2"], prep["be2"],
            prep["wa"], prep["ba"])

    flops = int(2 * R * (Kpad * HID + HID * C1 + C1 * C2)
                + 2 * N_SLOTS * Bpad * C2 * Apad
                + 16 * R * (HID + C1 + C2))
    transcendentals = int(Bpad * Apad + C1 + C2)
    bytes_accessed = int(sum(int(np.prod(a.shape)) for a in args) * 4
                         + Bpad * Apad * 4)

    vmem = pl.BlockSpec(memory_space=pltpu.MemorySpace.VMEM)
    kernel = functools.partial(actor_kernel, inv_n=1.0 / float(N_SLOTS * B))
    out = pl.pallas_call(
        kernel,
        out_shape=jax.ShapeDtypeStruct((Bpad, Apad), jnp.float32),
        in_specs=[vmem] * len(args),
        out_specs=vmem,
        cost_estimate=pl.CostEstimate(flops=flops,
                                      transcendentals=transcendentals,
                                      bytes_accessed=bytes_accessed),
    )(*args)
    return out[:B, :num_action]


def actor_reference(params, sp, sm, sh):
    """Pure-JAX reference mirroring the PyTorch forward (training-mode BN)."""
    def branch(x, w, b):
        return jax.nn.relu(x @ w + b)

    feats = []
    for i in range(4):
        feats.append(branch(sp[:, i, :], params["wp"][i], params["bp"][i]))
    for i in range(3):
        feats.append(branch(sh[:, i, :], params["wh"][i], params["bh"][i]))
    for i in range(4):
        feats.append(branch(sm[:, i, :], params["wm"][i], params["bm"][i]))
    feat = jnp.stack(feats, axis=1)                             # (B, 11, 128)

    z = jnp.einsum("blc,co->blo", feat, params["wc1"]) + params["bc1"]
    m, v = z.mean((0, 1)), ((z - z.mean((0, 1))) ** 2).mean((0, 1))
    z = jax.nn.relu((z - m) * lax.rsqrt(v + BN_EPS) * params["g1"] + params["be1"])

    y = jnp.einsum("blc,co->blo", z, params["wc2"]) + params["bc2"]
    m2, v2 = y.mean((0, 1)), ((y - y.mean((0, 1))) ** 2).mean((0, 1))
    y = jax.nn.relu((y - m2) * lax.rsqrt(v2 + BN_EPS) * params["g2"] + params["be2"])

    out = jnp.einsum("blc,lca->ba", y, params["wa"]) + params["ba"]
    return jnp.tanh(out) * MAX_ACTION


def init_params(key, num_state_p, num_state_m, num_state_h, num_action):
    ks = jax.random.split(key, 16)
    s = 0.1
    f32 = jnp.float32
    return {
        "wp": jax.random.normal(ks[0], (4, num_state_p, HID), f32) * s,
        "bp": jax.random.normal(ks[1], (4, HID), f32) * s,
        "wm": jax.random.normal(ks[2], (4, num_state_m, HID), f32) * s,
        "bm": jax.random.normal(ks[3], (4, HID), f32) * s,
        "wh": jax.random.normal(ks[4], (3, num_state_h, HID), f32) * s,
        "bh": jax.random.normal(ks[5], (3, HID), f32) * s,
        "wc1": jax.random.normal(ks[6], (HID, C1), f32) * s,
        "bc1": jax.random.normal(ks[7], (1, C1), f32) * s,
        "g1": 1.0 + jax.random.normal(ks[8], (1, C1), f32) * s,
        "be1": jax.random.normal(ks[9], (1, C1), f32) * s,
        "wc2": jax.random.normal(ks[10], (C1, C2), f32) * s,
        "bc2": jax.random.normal(ks[11], (1, C2), f32) * s,
        "g2": 1.0 + jax.random.normal(ks[12], (1, C2), f32) * s,
        "be2": jax.random.normal(ks[13], (1, C2), f32) * s,
        # wa[l, c, a]  <->  PyTorch action.weight[a, c*11 + l]
        "wa": jax.random.normal(ks[14], (N_SLOTS, C2, num_action), f32) * s,
        "ba": jax.random.normal(ks[15], (1, num_action), f32) * s,
    }
    # TODO(synk): BatchNorm running_mean/running_var buffer updates (a training
    # side effect of the PyTorch forward) are not materialized here; if added,
    # the conv biases bc1/bc2 must be reintroduced on the stats path.


if __name__ == "__main__":
    B = 2
    num_state_p, num_state_m, num_state_h = 8, 12, 16
    num_action = 4

    key = jax.random.PRNGKey(0)
    kp, km, kh, kw = jax.random.split(key, 4)
    states_p = jax.random.normal(kp, (B, 4, num_state_p), jnp.float32)
    states_m = jax.random.normal(km, (B, 4, num_state_m), jnp.float32)
    states_h = jax.random.normal(kh, (B, 3, num_state_h), jnp.float32)

    params = init_params(kw, num_state_p, num_state_m, num_state_h, num_action)
    prep = prepare_actor_params(params, batch_size=B)

    out = actor_forward(prep, states_p, states_m, states_h,
                        num_action=num_action)
    out = jax.block_until_ready(out)

    ref = actor_reference(params, states_p, states_m, states_h)
    np.testing.assert_allclose(np.asarray(out), np.asarray(ref),
                               rtol=2e-3, atol=2e-3)
    assert out.shape == (B, num_action)

    print("KERNEL_OK")
</pallas_src>

<mosaic_0001>
module attributes {stable_mosaic.version = 11 : i64} {
  func.func @actor_kernel(%arg0: memref<88x128xf32, #tpu.memory_space<vmem>>, %arg1: memref<128x128xf32, #tpu.memory_space<vmem>>, %arg2: memref<88x128xf32, #tpu.memory_space<vmem>>, %arg3: memref<88x1xf32, #tpu.memory_space<vmem>>, %arg4: memref<128x32xf32, #tpu.memory_space<vmem>>, %arg5: memref<1x32xf32, #tpu.memory_space<vmem>>, %arg6: memref<1x32xf32, #tpu.memory_space<vmem>>, %arg7: memref<32x16xf32, #tpu.memory_space<vmem>>, %arg8: memref<1x16xf32, #tpu.memory_space<vmem>>, %arg9: memref<1x16xf32, #tpu.memory_space<vmem>>, %arg10: memref<11x16x128xf32, #tpu.memory_space<vmem>>, %arg11: memref<1x128xf32, #tpu.memory_space<vmem>>, %arg12: memref<8x128xf32, #tpu.memory_space<vmem>>) attributes {dimension_semantics = [], scalar_prefetch = 0 : i64, scratch_operands = 0 : i64, tpu.core_type = #tpu.core_type<tc>} {
    %c0 = arith.constant 0 : index
    %c0_0 = arith.constant 0 : index
    %0 = vector.load %arg0[%c0, %c0_0] : memref<88x128xf32, #tpu.memory_space<vmem>>, vector<88x128xf32>
    %c0_1 = arith.constant 0 : index
    %c0_2 = arith.constant 0 : index
    %1 = vector.load %arg1[%c0_1, %c0_2] : memref<128x128xf32, #tpu.memory_space<vmem>>, vector<128x128xf32>
    %cst = arith.constant dense<0.000000e+00> : vector<88x128xf32>
    %2 = tpu.matmul %0, %1, %cst {dimension_numbers = #tpu.dot_dimension_numbers<[1], [0], [0], [1], [0, 0, 1, 1], [], []>} : vector<88x128xf32>, vector<128x128xf32>, vector<88x128xf32> -> vector<88x128xf32>
    %c0_3 = arith.constant 0 : index
    %c0_4 = arith.constant 0 : index
    %3 = vector.load %arg2[%c0_3, %c0_4] : memref<88x128xf32, #tpu.memory_space<vmem>>, vector<88x128xf32>
    %4 = arith.addf %2, %3 : vector<88x128xf32>
    %cst_5 = arith.constant 0.000000e+00 : f32
    %5 = vector.broadcast %cst_5 : f32 to vector<88x128xf32>
    %6 = arith.maximumf %4, %5 : vector<88x128xf32>
    %c0_6 = arith.constant 0 : index
    %c0_7 = arith.constant 0 : index
    %7 = vector.load %arg4[%c0_6, %c0_7] : memref<128x32xf32, #tpu.memory_space<vmem>>, vector<128x32xf32>
    %cst_8 = arith.constant dense<0.000000e+00> : vector<88x32xf32>
    %8 = tpu.matmul %6, %7, %cst_8 {dimension_numbers = #tpu.dot_dimension_numbers<[1], [0], [0], [1], [0, 0, 1, 1], [], []>} : vector<88x128xf32>, vector<128x32xf32>, vector<88x32xf32> -> vector<88x32xf32>
    %cst_9 = arith.constant dense<0.000000e+00> : vector<32xf32>
    %9 = vector.multi_reduction <add>, %8, %cst_9 [0] : vector<88x32xf32> to vector<32xf32>
    %10 = vector.shape_cast %9 : vector<32xf32> to vector<1x32xf32>
    %cst_10 = arith.constant 0.0454545468 : f32
    %11 = vector.broadcast %cst_10 : f32 to vector<1x32xf32>
    %12 = arith.mulf %10, %11 : vector<1x32xf32>
    %13 = arith.mulf %8, %8 : vector<88x32xf32>
    %cst_11 = arith.constant dense<0.000000e+00> : vector<32xf32>
    %14 = vector.multi_reduction <add>, %13, %cst_11 [0] : vector<88x32xf32> to vector<32xf32>
    %15 = vector.shape_cast %14 : vector<32xf32> to vector<1x32xf32>
    %cst_12 = arith.constant 0.0454545468 : f32
    %16 = vector.broadcast %cst_12 : f32 to vector<1x32xf32>
    %17 = arith.mulf %15, %16 : vector<1x32xf32>
    %18 = arith.mulf %12, %12 : vector<1x32xf32>
    %19 = arith.subf %17, %18 : vector<1x32xf32>
    %cst_13 = arith.constant 0.000000e+00 : f32
    %20 = vector.broadcast %cst_13 : f32 to vector<1x32xf32>
    %21 = arith.maximumf %19, %20 : vector<1x32xf32>
    %22 = vector.broadcast %12 : vector<1x32xf32> to vector<88x32xf32>
    %23 = arith.subf %8, %22 : vector<88x32xf32>
    %cst_14 = arith.constant 9.99999974E-6 : f32
    %24 = vector.broadcast %cst_14 : f32 to vector<1x32xf32>
    %25 = arith.addf %21, %24 : vector<1x32xf32>
    %26 = math.rsqrt %25 : vector<1x32xf32>
    %27 = vector.broadcast %26 : vector<1x32xf32> to vector<88x32xf32>
    %28 = arith.mulf %23, %27 : vector<88x32xf32>
    %c0_15 = arith.constant 0 : index
    %c0_16 = arith.constant 0 : index
    %29 = vector.load %arg5[%c0_15, %c0_16] : memref<1x32xf32, #tpu.memory_space<vmem>>, vector<1x32xf32>
    %30 = vector.broadcast %29 : vector<1x32xf32> to vector<88x32xf32>
    %31 = arith.mulf %28, %30 : vector<88x32xf32>
    %c0_17 = arith.constant 0 : index
    %c0_18 = arith.constant 0 : index
    %32 = vector.load %arg6[%c0_17, %c0_18] : memref<1x32xf32, #tpu.memory_space<vmem>>, vector<1x32xf32>
    %33 = vector.broadcast %32 : vector<1x32xf32> to vector<88x32xf32>
    %34 = arith.addf %31, %33 : vector<88x32xf32>
    %cst_19 = arith.constant 0.000000e+00 : f32
    %35 = vector.broadcast %cst_19 : f32 to vector<88x32xf32>
    %36 = arith.maximumf %34, %35 : vector<88x32xf32>
    %c0_20 = arith.constant 0 : index
    %c0_21 = arith.constant 0 : index
    %37 = vector.load %arg3[%c0_20, %c0_21] : memref<88x1xf32, #tpu.memory_space<vmem>>, vector<88x1xf32>
    %38 = vector.broadcast %37 : vector<88x1xf32> to vector<88x32xf32>
    %39 = arith.mulf %36, %38 : vector<88x32xf32>
    %c0_22 = arith.constant 0 : index
    %c0_23 = arith.constant 0 : index
    %40 = vector.load %arg7[%c0_22, %c0_23] : memref<32x16xf32, #tpu.memory_space<vmem>>, vector<32x16xf32>
    %cst_24 = arith.constant dense<0.000000e+00> : vector<88x16xf32>
    %41 = tpu.matmul %39, %40, %cst_24 {dimension_numbers = #tpu.dot_dimension_numbers<[1], [0], [0], [1], [0, 0, 1, 1], [], []>} : vector<88x32xf32>, vector<32x16xf32>, vector<88x16xf32> -> vector<88x16xf32>
    %cst_25 = arith.constant dense<0.000000e+00> : vector<16xf32>
    %42 = vector.multi_reduction <add>, %41, %cst_25 [0] : vector<88x16xf32> to vector<16xf32>
    %43 = vector.shape_cast %42 : vector<16xf32> to vector<1x16xf32>
    %cst_26 = arith.constant 0.0454545468 : f32
    %44 = vector.broadcast %cst_26 : f32 to vector<1x16xf32>
    %45 = arith.mulf %43, %44 : vector<1x16xf32>
    %46 = arith.mulf %41, %41 : vector<88x16xf32>
    %cst_27 = arith.constant dense<0.000000e+00> : vector<16xf32>
    %47 = vector.multi_reduction <add>, %46, %cst_27 [0] : vector<88x16xf32> to vector<16xf32>
    %48 = vector.shape_cast %47 : vector<16xf32> to vector<1x16xf32>
    %cst_28 = arith.constant 0.0454545468 : f32
    %49 = vector.broadcast %cst_28 : f32 to vector<1x16xf32>
    %50 = arith.mulf %48, %49 : vector<1x16xf32>
    %51 = arith.mulf %45, %45 : vector<1x16xf32>
    %52 = arith.subf %50, %51 : vector<1x16xf32>
    %cst_29 = arith.constant 0.000000e+00 : f32
    %53 = vector.broadcast %cst_29 : f32 to vector<1x16xf32>
    %54 = arith.maximumf %52, %53 : vector<1x16xf32>
    %55 = vector.broadcast %45 : vector<1x16xf32> to vector<88x16xf32>
    %56 = arith.subf %41, %55 : vector<88x16xf32>
    %cst_30 = arith.constant 9.99999974E-6 : f32
    %57 = vector.broadcast %cst_30 : f32 to vector<1x16xf32>
    %58 = arith.addf %54, %57 : vector<1x16xf32>
    %59 = math.rsqrt %58 : vector<1x16xf32>
    %60 = vector.broadcast %59 : vector<1x16xf32> to vector<88x16xf32>
    %61 = arith.mulf %56, %60 : vector<88x16xf32>
    %c0_31 = arith.constant 0 : index
    %c0_32 = arith.constant 0 : index
    %62 = vector.load %arg8[%c0_31, %c0_32] : memref<1x16xf32, #tpu.memory_space<vmem>>, vector<1x16xf32>
    %63 = vector.broadcast %62 : vector<1x16xf32> to vector<88x16xf32>
    %64 = arith.mulf %61, %63 : vector<88x16xf32>
    %c0_33 = arith.constant 0 : index
    %c0_34 = arith.constant 0 : index
    %65 = vector.load %arg9[%c0_33, %c0_34] : memref<1x16xf32, #tpu.memory_space<vmem>>, vector<1x16xf32>
    %66 = vector.broadcast %65 : vector<1x16xf32> to vector<88x16xf32>
    %67 = arith.addf %64, %66 : vector<88x16xf32>
    %cst_35 = arith.constant 0.000000e+00 : f32
    %68 = vector.broadcast %cst_35 : f32 to vector<88x16xf32>
    %69 = arith.maximumf %67, %68 : vector<88x16xf32>
    %70 = vector.shape_cast %69 : vector<88x16xf32> to vector<11x8x16xf32>
    %c0_36 = arith.constant 0 : index
    %c0_37 = arith.constant 0 : index
    %c0_38 = arith.constant 0 : index
    %71 = vector.load %arg10[%c0_36, %c0_37, %c0_38] : memref<11x16x128xf32, #tpu.memory_space<vmem>>, vector<11x16x128xf32>
    "tpu.trace_start"() <{level = 10 : i32, message = "lbc,lca->lba"}> : () -> ()
    %cst_39 = arith.constant dense<0.000000e+00> : vector<11x8x128xf32>
    %72 = tpu.matmul %70, %71, %cst_39 {dimension_numbers = #tpu.dot_dimension_numbers<[2], [1], [1], [2], [0, 0, 0, 1, 1, 2], [0], [0]>} : vector<11x8x16xf32>, vector<11x16x128xf32>, vector<11x8x128xf32> -> vector<11x8x128xf32>
    "tpu.trace_stop"() : () -> ()
    %cst_40 = arith.constant dense<0.000000e+00> : vector<8x128xf32>
    %73 = vector.multi_reduction <add>, %72, %cst_40 [0] : vector<11x8x128xf32> to vector<8x128xf32>
    %c0_41 = arith.constant 0 : index
    %c0_42 = arith.constant 0 : index
    %74 = vector.load %arg11[%c0_41, %c0_42] : memref<1x128xf32, #tpu.memory_space<vmem>>, vector<1x128xf32>
    %75 = vector.broadcast %74 : vector<1x128xf32> to vector<8x128xf32>
    %76 = arith.addf %73, %75 : vector<8x128xf32>
    %77 = math.tanh %76 : vector<8x128xf32>
    %cst_43 = arith.constant 5.000000e-01 : f32
    %78 = vector.broadcast %cst_43 : f32 to vector<8x128xf32>
    %79 = arith.mulf %77, %78 : vector<8x128xf32>
    %c0_44 = arith.constant 0 : index
    %c0_45 = arith.constant 0 : index
    %80 = vector.load %arg12[%c0_44, %c0_45] : memref<8x128xf32, #tpu.memory_space<vmem>>, vector<8x128xf32>
    tpu.vector_store %arg12[%c0_44, %c0_45], %79 {strides = array<i32>} : memref<8x128xf32, #tpu.memory_space<vmem>>, vector<8x128xf32>,
    return
  }
}

</mosaic_0001>

<bundles_post_ra>
// kernel: actor_forward.1
= control target key start
LH: loop header
LB: loop body
LE: loop exit
PB: predicated region body
PF: predicated region fallthrough
CT: control target
= control target key end

     0   :  { %v2190_v0 = vmov 0.0|0.0   ;;  %vm2191_vm0 = vmmov 0   ;;  %v2192_v4 = vmov 0.0   ;;  %v2193_v61 = vmov 0   ;;  %s2914_s1 = inlined_call_operand.vmem [shape: f32[128,128], index: 1, kind: input, shape index: {}]   ;;  %s2915_s4 = inlined_call_operand.vmem [shape: f32[128,32], index: 4, kind: input, shape index: {}]   ;;  %s2916_s0 = inlined_call_operand.vmem [shape: f32[88,128], index: 0, kind: input, shape index: {}]   ;;  %s2917_s3 = inlined_call_operand.vmem [shape: f32[88,1], index: 3, kind: input, shape index: {}]   ;;  %s2918_s2 = inlined_call_operand.vmem [shape: f32[88,128], index: 2, kind: input, shape index: {}]   ;;  %s2919_s7 = inlined_call_operand.vmem [shape: f32[32,16], index: 7, kind: input, shape index: {}]   ;;  %s2920_s5 = inlined_call_operand.vmem [shape: f32[1,32], index: 5, kind: input, shape index: {}]   ;;  %s2921_s6 = inlined_call_operand.vmem [shape: f32[1,32], index: 6, kind: input, shape index: {}]   ;;  %s2922_s10 = inlined_call_operand.vmem [shape: f32[11,16,128], index: 10, kind: input, shape index: {}]   ;;  %s2923_s8 = inlined_call_operand.vmem [shape: f32[1,16], index: 8, kind: input, shape index: {}]   ;;  %s2924_s9 = inlined_call_operand.vmem [shape: f32[1,16], index: 9, kind: input, shape index: {}]   ;;  %s2925_s11 = inlined_call_operand.vmem [shape: f32[1,128], index: 11, kind: input, shape index: {}]   ;;  %s2926_s12 = inlined_call_operand.vmem [shape: f32[8,128], index: 12, kind: output, shape index: {}]  }
   0x1   :  { %2091 = vmatprep.subr.bf16.mxu0 %v2190_v0  ;;  %v52_v1 = vld [vmem:[%s2914_s1] sm:$0xff]  ;;  %v53_v2 = vld [vmem:[%s2914_s1 + $0x8] sm:$0xff]  ;;  %v54_v3 = vld [vmem:[%s2914_s1 + $0x10] sm:$0xff]  ;;  %1875 = vmatprep.mubr.msk.f32.mxu0 %vm2191_vm0, %v2192_v4  ;;  %vm346_vm1 = vcmask 261120   ;;  %vm722_vm2 = vcmask 130048  }
   0x2   :  { %v2092_v5 = vpack.c.bf16 %v53_v2, %v52_v1  ;;  %v55_v6 = vld [vmem:[%s2914_s1 + $0x18] sm:$0xff]  ;;  %2115 = vmatprep.subr.bf16.mxu1 %v2190_v0  ;;  %1940 = vmatprep.mubr.msk.f32.mxu1 %vm2191_vm0, %v2192_v4  ;;  %v56_v8 = vld [vmem:[%s2914_s1 + $0x20] sm:$0xff]  ;;  %v57_v9 = vld [vmem:[%s2914_s1 + $0x28] sm:$0xff] }
   0x3   :  { %v2095_v7 = vpack.c.bf16 %v55_v6, %v54_v3  ;;  %v2098_v10 = vpack.c.bf16 %v57_v9, %v56_v8  ;;  %v58_v11 = vld [vmem:[%s2914_s1 + $0x30] sm:$0xff]  ;;  %v59_v12 = vld [vmem:[%s2914_s1 + $0x38] sm:$0xff]  ;;  %v210_v13 = vld [vmem:[%s2915_s4] sm:$0xff]  ;;  %2182 = vset.pattern.permute.xlu0 %v2193_v61  ;;  %2183 = vset.pattern.permute.xlu1 %v2193_v61 }
   0x4   :  { %2093 = vmatpush3.bf16.msra.mxu0 %v2092_v5  ;;  %v211_v14 = vld [vmem:[%s2915_s4 + $0x8] sm:$0xff]  ;;  %v212_v15 = vld [vmem:[%s2915_s4 + $0x10] sm:$0xff]  ;;  %v213_v17 = vld [vmem:[%s2915_s4 + $0x18] sm:$0xff]  ;;  %v2101_v18 = vpack.c.bf16 %v59_v12, %v58_v11 }
   0x5   :  { %2094 = vmatprep.subr.bf16.mxu0 %v2190_v0  ;;  %v2116_v16 = vpack.c.bf16 %v211_v14, %v210_v13  ;;  %v60_v19 = vld [vmem:[%s2914_s1 + $0x40] sm:$0xff]  ;;  %v61_v20 = vld [vmem:[%s2914_s1 + $0x48] sm:$0xff]  ;;  %v2119_v21 = vpack.c.bf16 %v213_v17, %v212_v15  ;;  %v62_v25 = vld [vmem:[%s2914_s1 + $0x50] sm:$0xff] }
   0x6   :  { %v214_v22 = vld [vmem:[%s2915_s4 + $0x20] sm:$0xff]  ;;  %v215_v23 = vld [vmem:[%s2915_s4 + $0x28] sm:$0xff]  ;;  %v2104_v24 = vpack.c.bf16 %v61_v20, %v60_v19  ;;  %v63_v26 = vld [vmem:[%s2914_s1 + $0x58] sm:$0xff] }
   0x7   :  { %2117 = vmatpush3.bf16.msra.mxu1 %v2116_v16  ;;  %v2122_v27 = vpack.c.bf16 %v215_v23, %v214_v22  ;;  %v216_v28 = vld [vmem:[%s2915_s4 + $0x30] sm:$0xff]  ;;  %v217_v29 = vld [vmem:[%s2915_s4 + $0x38] sm:$0xff]  ;;  %v2107_v30 = vpack.c.bf16 %v63_v26, %v62_v25  ;;  %v64_v31 = vld [vmem:[%s2914_s1 + $0x60] sm:$0xff] }
   0x8   :  { %2096 = vmatpush3.bf16.msra.mxu0 %v2095_v7  ;;  %2118 = vmatprep.subr.bf16.mxu1 %v2190_v0  ;;  %v65_v32 = vld [vmem:[%s2914_s1 + $0x68] sm:$0xff]  ;;  %v2125_v33 = vpack.c.bf16 %v217_v29, %v216_v28  ;;  %v218_v34 = vld [vmem:[%s2915_s4 + $0x40] sm:$0xff]  ;;  %v66_v37 = vld [vmem:[%s2914_s1 + $0x70] sm:$0xff] }
   0x9   :  { %2097 = vmatprep.subr.bf16.mxu0 %v2190_v0  ;;  %v219_v35 = vld [vmem:[%s2915_s4 + $0x48] sm:$0xff]  ;;  %v2110_v36 = vpack.c.bf16 %v65_v32, %v64_v31  ;;  %v67_v38 = vld [vmem:[%s2914_s1 + $0x78] sm:$0xff]  ;;  %v220_v40 = vld [vmem:[%s2915_s4 + $0x50] sm:$0xff] }
   0xa   :  { %v2128_v39 = vpack.c.bf16 %v219_v35, %v218_v34  ;;  %v221_v41 = vld [vmem:[%s2915_s4 + $0x58] sm:$0xff]  ;;  %v2113_v42 = vpack.c.bf16 %v67_v38, %v66_v37  ;;  %v222_v44 = vld [vmem:[%s2915_s4 + $0x60] sm:$0xff]  ;;  %v223_v45 = vld [vmem:[%s2915_s4 + $0x68] sm:$0xff] }
   0xb   :  { %2120 = vmatpush3.bf16.msra.mxu1 %v2119_v21  ;;  %v2131_v43 = vpack.c.bf16 %v221_v41, %v220_v40  ;;  %v41_v46 = vld [vmem:[%s2916_s0] sm:$0xff]  ;;  %v2134_v47 = vpack.c.bf16 %v223_v45, %v222_v44  ;;  %v42_v48 = vld [vmem:[%s2916_s0 + $0x8] sm:$0xff]  ;;  %v43_v49 = vld [vmem:[%s2916_s0 + $0x10] sm:$0xff] }
   0xc   :  { %2099 = vmatpush3.bf16.msra.mxu0 %v2098_v10  ;;  %2121 = vmatprep.subr.bf16.mxu1 %v2190_v0  ;;  %v44_v50 = vld [vmem:[%s2916_s0 + $0x18] sm:$0xff]  ;;  %v45_v51 = vld [vmem:[%s2916_s0 + $0x20] sm:$0xff]  ;;  %v46_v52 = vld [vmem:[%s2916_s0 + $0x28] sm:$0xff] }
   0xd   :  { %2100 = vmatprep.subr.bf16.mxu0 %v2190_v0  ;;  %v47_v53 = vld [vmem:[%s2916_s0 + $0x30] sm:$0xff]  ;;  %v48_v54 = vld [vmem:[%s2916_s0 + $0x38] sm:$0xff]  ;;  %v49_v55 = vld [vmem:[%s2916_s0 + $0x40] sm:$0xff] }
   0xe   :  { %v50_v56 = vld [vmem:[%s2916_s0 + $0x48] sm:$0xff]  ;;  %v51_v57 = vld [vmem:[%s2916_s0 + $0x50] sm:$0xff]  ;;  %v225_v59 = vld [vmem:[%s2915_s4 + $0x78] sm:$0xff] }
   0xf   :  { %2123 = vmatpush3.bf16.msra.mxu1 %v2122_v27  ;;  %v224_v58 = vld [vmem:[%s2915_s4 + $0x70] sm:$0xff]  ;;  %v488_v62 = vld [vmem:[%s2917_s3] sm:$0xff]  ;;  %v489_v1 = vld [vmem:[%s2917_s3 + $0x8] sm:$0xff] }
  0x10   :  { %2102 = vmatpush3.bf16.msra.mxu0 %v2101_v18  ;;  %2124 = vmatprep.subr.bf16.mxu1 %v2190_v0  ;;  %v2137_v60 = vpack.c.bf16 %v225_v59, %v224_v58  ;;  %v490_v63 = vld [vmem:[%s2917_s3 + $0x10] sm:$0xff]  ;;  %v491_v2 = vld [vmem:[%s2917_s3 + $0x18] sm:$0xff]  ;;  %v492_v3 = vld [vmem:[%s2917_s3 + $0x20] sm:$0xff] }
  0x11   :  { %2103 = vmatprep.subr.bf16.mxu0 %v2190_v0  ;;  %501 = vperm.xlu0 %2182, %v488_v62   ;;  %v493_v5 = vld [vmem:[%s2917_s3 + $0x28] sm:$0xff]  ;;  %v494_v6 = vld [vmem:[%s2917_s3 + $0x30] sm:$0xff]  ;;  %v495_v7 = vld [vmem:[%s2917_s3 + $0x38] sm:$0xff] }
  0x12   :  { %511 = vperm.xlu1 %2183, %v490_v63   ;;  %v496_v8 = vld [vmem:[%s2917_s3 + $0x40] sm:$0xff]  ;;  %v497_v9 = vld [vmem:[%s2917_s3 + $0x48] sm:$0xff]  ;;  %v498_v10 = vld [vmem:[%s2917_s3 + $0x50] sm:$0xff] }
  0x13   :  { %2126 = vmatpush3.bf16.msra.mxu1 %v2125_v33  ;;  %v68_v11 = vld [vmem:[%s2918_s2] sm:$0xff]  ;;  %v69_v15 = vld [vmem:[%s2918_s2 + $0x8] sm:$0xff]  ;;  %v70_v20 = vld [vmem:[%s2918_s2 + $0x10] sm:$0xff] }
  0x14   :  { %2105 = vmatpush3.bf16.msra.mxu0 %v2104_v24  ;;  %2127 = vmatprep.subr.bf16.mxu1 %v2190_v0  ;;  %v71_v25 = vld [vmem:[%s2918_s2 + $0x18] sm:$0xff]  ;;  %v73_v35 = vld [vmem:[%s2918_s2 + $0x28] sm:$0xff]  ;;  %v74_v40 = vld [vmem:[%s2918_s2 + $0x30] sm:$0xff] }
  0x15   :  { %2106 = vmatprep.subr.bf16.mxu0 %v2190_v0  ;;  %506 = vperm.xlu0 %2182, %v489_v1   ;;  %v75_v45 = vld [vmem:[%s2918_s2 + $0x38] sm:$0xff] }
  0x16   :  { %516 = vperm.xlu1 %2183, %v491_v2  }
  0x17   :  { %2129 = vmatpush3.bf16.msra.mxu1 %v2128_v39 }
  0x18   :  { %2108 = vmatpush3.bf16.msra.mxu0 %v2107_v30  ;;  %2130 = vmatprep.subr.bf16.mxu1 %v2190_v0  ;;  %v72_v30 = vld [vmem:[%s2918_s2 + $0x20] sm:$0xff] }
  0x19   :  { %2109 = vmatprep.subr.bf16.mxu0 %v2190_v0  ;;  %521 = vperm.xlu0 %2182, %v492_v3   ;;  %v565_v3 = vld [vmem:[%s2919_s7] sm:$0xff] }
  0x1a   :  { %526 = vperm.xlu1 %2183, %v493_v5   ;;  %v566_v5 = vld [vmem:[%s2919_s7 + $0x8] sm:$0xff] }
  0x1b   :  { %2132 = vmatpush3.bf16.msra.mxu1 %v2131_v43 }
  0x1c   :  { %2111 = vmatpush3.bf16.msra.mxu0 %v2110_v36  ;;  %2133 = vmatprep.subr.bf16.mxu1 %v2190_v0 }
  0x1d   :  { %2112 = vmatprep.subr.bf16.mxu0 %v2190_v0  ;;  %531 = vperm.xlu0 %2182, %v494_v6   ;;  %v2140_v6 = vpack.c.bf16 %v566_v5, %v565_v3 }
  0x1e   :  { %536 = vperm.xlu1 %2183, %v495_v7   ;;  %v567_v7 = vld [vmem:[%s2919_s7 + $0x10] sm:$0xff] }
  0x1f   :  { %2135 = vmatpush3.bf16.msra.mxu1 %v2134_v47 }
  0x20   :  { %2114 = vmatpush3.bf16.msra.mxu0 %v2113_v42  ;;  %2136 = vmatprep.subr.bf16.mxu1 %v2190_v0 }
  0x21   :  { %2139 = vmatprep.subr.bf16.mxu0 %v2190_v0  ;;  %541 = vperm.xlu0 %2182, %v496_v8   ;;  %v568_v8 = vld [vmem:[%s2919_s7 + $0x18] sm:$0xff] }
  0x22   :  { %546 = vperm.xlu1 %2183, %v497_v9   ;;  %v2143_v9 = vpack.c.bf16 %v568_v8, %v567_v7 }
  0x23   :  { %1876 = vmatmul.mubr.f32.vlgmr.msra.gmra.mrb[0].mxu0 %v41_v46  ;;  %2138 = vmatpush3.bf16.msra.mxu1 %v2137_v60  ;;  %v78_v60 = vld [vmem:[%s2918_s2 + $0x50] sm:$0xff] }
  0x24   :  { %1878 = vmatprep.mubr.msk.f32.mxu0 %vm2191_vm0, %v2192_v4  ;;  %2145 = vmatprep.subr.bf16.mxu1 %v2190_v0 }
  0x25   :  { %551 = vperm.xlu0 %2182, %v498_v10   ;;  %2141 = vmatpush3.bf16.msra.mxu0 %v2140_v6 }
  0x26   :  { %2142 = vmatprep.subr.bf16.mxu0 %v2190_v0 }
  0x27   :  { %1879 = vmatmul.mubr.f32.gmra.mrb[2].mxu0 %v42_v48 }
  0x28   :  { %1881 = vmatprep.mubr.msk.f32.mxu0 %vm2191_vm0, %v2192_v4 }
  0x29   :  { %2144 = vmatpush3.bf16.msra.mxu0 %v2143_v9 }
  0x2b   :  { %1882 = vmatmul.mubr.f32.gmra.mrb[4].mxu0 %v43_v49 }
  0x2c   :  { %1884 = vmatprep.mubr.msk.f32.mxu0 %vm2191_vm0, %v2192_v4 }
  0x2f   :  { %1885 = vmatmul.mubr.f32.gmra.mrb[6].mxu0 %v44_v50  ;;  %v76_v50 = vld [vmem:[%s2918_s2 + $0x40] sm:$0xff] }
  0x30   :  { %1887 = vmatprep.mubr.msk.f32.mxu0 %vm2191_vm0, %v2192_v4 }
  0x33   :  { %1888 = vmatmul.mubr.f32.gmra.mrb[8].mxu0 %v45_v51 }
  0x34   :  { %1890 = vmatprep.mubr.msk.f32.mxu0 %vm2191_vm0, %v2192_v4 }
  0x37   :  { %1891 = vmatmul.mubr.f32.gmra.mrb[10].mxu0 %v46_v52 }
  0x38   :  { %1893 = vmatprep.mubr.msk.f32.mxu0 %vm2191_vm0, %v2192_v4 }
  0x3b   :  { %1894 = vmatmul.mubr.f32.gmra.mrb[12].mxu0 %v47_v53 }
  0x3c   :  { %1896 = vmatprep.mubr.msk.f32.mxu0 %vm2191_vm0, %v2192_v4 }
  0x3f   :  { %1897 = vmatmul.mubr.f32.gmra.mrb[14].mxu0 %v48_v54 }
  0x40   :  { %1899 = vmatprep.mubr.msk.f32.mxu0 %vm2191_vm0, %v2192_v4 }
  0x43   :  { %1900 = vmatmul.mubr.f32.gmra.mrb[16].mxu0 %v49_v55  ;;  %v77_v55 = vld [vmem:[%s2918_s2 + $0x48] sm:$0xff] }
  0x44   :  { %1902 = vmatprep.mubr.msk.f32.mxu0 %vm2191_vm0, %v2192_v4 }
  0x47   :  { %1903 = vmatmul.mubr.f32.gmra.mrb[18].mxu0 %v50_v56 }
  0x48   :  { %1905 = vmatprep.mubr.msk.f32.mxu0 %vm2191_vm0, %v2192_v4 }
  0x4b   :  { %1906 = vmatmul.mubr.f32.gmra.mrb[20].mxu0 %v51_v57 }
  0x4c   :  { %1981 = vmatprep.mubr.msk.f32.mxu0 %vm2191_vm0, %v2192_v4 }
  0xf6   :  { %v145_v12 = vpop.f32.mrb[0].mxu0 }
  0xf7   :  { %v146_v13 = vadd.f32 %v145_v12, %v68_v11  ;;  %v1877_v14 = vpop.f32.mrb[1].mxu0 }
  0xf9   :  { %v199_v16 = vmax.f32 %v146_v13, 0.0 }
  0xfa   :  { %v150_v17 = vpop.f32.mrb[2].mxu0 }
  0xfb   :  { %v151_v18 = vadd.f32 %v150_v17, %v69_v15  ;;  %v1880_v19 = vpop.f32.mrb[3].mxu0  ;;  %1941 = vmatmul.mubr.f32.vlgmr.msra.gmra.mrb[0].mxu1 %v199_v16 }
  0xfc   :  { %1943 = vmatprep.mubr.msk.f32.mxu1 %vm2191_vm0, %v2192_v4 }
  0xfd   :  { %v200_v21 = vmax.f32 %v151_v18, 0.0 }
  0xfe   :  { %v155_v22 = vpop.f32.mrb[4].mxu0 }
  0xff   :  { %v156_v23 = vadd.f32 %v155_v22, %v70_v20  ;;  %v1883_v24 = vpop.f32.mrb[5].mxu0  ;;  %1944 = vmatmul.mubr.f32.gmra.mrb[2].mxu1 %v200_v21 }
 0x100   :  { %1946 = vmatprep.mubr.msk.f32.mxu1 %vm2191_vm0, %v2192_v4 }
 0x101   :  { %v201_v26 = vmax.f32 %v156_v23, 0.0 }
 0x102   :  { %v160_v27 = vpop.f32.mrb[6].mxu0 }
 0x103   :  { %v161_v28 = vadd.f32 %v160_v27, %v71_v25  ;;  %v1886_v29 = vpop.f32.mrb[7].mxu0  ;;  %1947 = vmatmul.mubr.f32.gmra.mrb[4].mxu1 %v201_v26 }
 0x104   :  { %1949 = vmatprep.mubr.msk.f32.mxu1 %vm2191_vm0, %v2192_v4 }
 0x105   :  { %v202_v31 = vmax.f32 %v161_v28, 0.0 }
 0x106   :  { %v165_v32 = vpop.f32.mrb[8].mxu0 }
 0x107   :  { %v166_v33 = vadd.f32 %v165_v32, %v72_v30  ;;  %v1889_v34 = vpop.f32.mrb[9].mxu0  ;;  %1950 = vmatmul.mubr.f32.gmra.mrb[6].mxu1 %v202_v31 }
 0x108   :  { %1952 = vmatprep.mubr.msk.f32.mxu1 %vm2191_vm0, %v2192_v4 }
 0x109   :  { %v203_v36 = vmax.f32 %v166_v33, 0.0 }
 0x10a   :  { %v170_v37 = vpop.f32.mrb[10].mxu0 }
 0x10b   :  { %v171_v38 = vadd.f32 %v170_v37, %v73_v35  ;;  %v1892_v39 = vpop.f32.mrb[11].mxu0  ;;  %1953 = vmatmul.mubr.f32.gmra.mrb[8].mxu1 %v203_v36 }
 0x10c   :  { %1955 = vmatprep.mubr.msk.f32.mxu1 %vm2191_vm0, %v2192_v4 }
 0x10d   :  { %v204_v41 = vmax.f32 %v171_v38, 0.0 }
 0x10e   :  { %v175_v42 = vpop.f32.mrb[12].mxu0 }
 0x10f   :  { %v176_v43 = vadd.f32 %v175_v42, %v74_v40  ;;  %v1895_v44 = vpop.f32.mrb[13].mxu0  ;;  %1956 = vmatmul.mubr.f32.gmra.mrb[10].mxu1 %v204_v41 }
 0x110   :  { %1958 = vmatprep.mubr.msk.f32.mxu1 %vm2191_vm0, %v2192_v4 }
 0x111   :  { %v205_v46 = vmax.f32 %v176_v43, 0.0 }
 0x112   :  { %v180_v47 = vpop.f32.mrb[14].mxu0 }
 0x113   :  { %v181_v48 = vadd.f32 %v180_v47, %v75_v45  ;;  %v1898_v49 = vpop.f32.mrb[15].mxu0  ;;  %1959 = vmatmul.mubr.f32.gmra.mrb[12].mxu1 %v205_v46 }
 0x114   :  { %1961 = vmatprep.mubr.msk.f32.mxu1 %vm2191_vm0, %v2192_v4 }
 0x115   :  { %v206_v51 = vmax.f32 %v181_v48, 0.0 }
 0x116   :  { %v185_v52 = vpop.f32.mrb[16].mxu0 }
 0x117   :  { %v186_v53 = vadd.f32 %v185_v52, %v76_v50  ;;  %v1901_v54 = vpop.f32.mrb[17].mxu0  ;;  %1962 = vmatmul.mubr.f32.gmra.mrb[14].mxu1 %v206_v51 }
 0x118   :  { %1964 = vmatprep.mubr.msk.f32.mxu1 %vm2191_vm0, %v2192_v4 }
 0x119   :  { %v207_v56 = vmax.f32 %v186_v53, 0.0 }
 0x11a   :  { %v190_v57 = vpop.f32.mrb[18].mxu0 }
 0x11b   :  { %v191_v58 = vadd.f32 %v190_v57, %v77_v55  ;;  %v1904_v59 = vpop.f32.mrb[19].mxu0  ;;  %1965 = vmatmul.mubr.f32.gmra.mrb[16].mxu1 %v207_v56 }
 0x11c   :  { %1967 = vmatprep.mubr.msk.f32.mxu1 %vm2191_vm0, %v2192_v4 }
 0x11d   :  { %v208_v61 = vmax.f32 %v191_v58, 0.0 }
 0x11e   :  { %v195_v62 = vpop.f32.mrb[20].mxu0 }
 0x11f   :  { %v196_v63 = vadd.f32 %v195_v62, %v78_v60  ;;  %v1907_v1 = vpop.f32.mrb[21].mxu0  ;;  %1968 = vmatmul.mubr.f32.gmra.mrb[18].mxu1 %v208_v61 }
 0x120   :  { %1970 = vmatprep.mubr.msk.f32.mxu1 %vm2191_vm0, %v2192_v4 }
 0x121   :  { %v209_v2 = vmax.f32 %v196_v63, 0.0 }
 0x123   :  { %1971 = vmatmul.mubr.f32.gmra.mrb[20].mxu1 %v209_v2 }
 0x124   :  { %2018 = vmatprep.mubr.msk.f32.mxu1 %vm2191_vm0, %v2192_v4 }
 0x1ce   :  { %v2533_v10 = vpop.f32.mrb[0].mxu1 }
 0x1cf   :  { %v1942_v11 = vpop.f32.mrb[1].mxu1  ;;  %v375_v12 = vmul.f32 %v2533_v10, %v2533_v10  ;;  %v347_v14 = vsel %vm346_vm1, %v2533_v10, 0.0 }
 0x1d1   :  { %v386_v19 = vsel %vm346_vm1, %v375_v12, 0.0 }
 0x1d2   :  { %v2537_v13 = vpop.f32.mrb[2].mxu1 }
 0x1d3   :  { %v348_v15 = vsel %vm346_vm1, %v2537_v13, 0.0  ;;  %v376_v16 = vmul.f32 %v2537_v13, %v2537_v13  ;;  %v1945_v17 = vpop.f32.mrb[3].mxu1 }
 0x1d4   :  { %v349_v18 = vadd.f32 %v348_v15, %v347_v14 }
 0x1d5   :  { %v387_v20 = vsel %vm346_vm1, %v376_v16, 0.0 }
 0x1d6   :  { %v388_v21 = vadd.f32 %v387_v20, %v386_v19  ;;  %v2547_v22 = vpop.f32.mrb[4].mxu1 }
 0x1d7   :  { %v350_v23 = vsel %vm346_vm1, %v2547_v22, 0.0  ;;  %v377_v24 = vmul.f32 %v2547_v22, %v2547_v22  ;;  %v1948_v25 = vpop.f32.mrb[5].mxu1 }
 0x1d8   :  { %v351_v26 = vadd.f32 %v350_v23, %v349_v18 }
 0x1d9   :  { %v389_v27 = vsel %vm346_vm1, %v377_v24, 0.0 }
 0x1da   :  { %v390_v28 = vadd.f32 %v389_v27, %v388_v21  ;;  %v2554_v29 = vpop.f32.mrb[6].mxu1 }
 0x1db   :  { %v352_v30 = vsel %vm346_vm1, %v2554_v29, 0.0  ;;  %v378_v31 = vmul.f32 %v2554_v29, %v2554_v29  ;;  %v1951_v32 = vpop.f32.mrb[7].mxu1 }
 0x1dc   :  { %v353_v33 = vadd.f32 %v352_v30, %v351_v26 }
 0x1dd   :  { %v391_v34 = vsel %vm346_vm1, %v378_v31, 0.0 }
 0x1de   :  { %v392_v35 = vadd.f32 %v391_v34, %v390_v28  ;;  %v2561_v36 = vpop.f32.mrb[8].mxu1 }
 0x1df   :  { %v354_v37 = vsel %vm346_vm1, %v2561_v36, 0.0  ;;  %v379_v38 = vmul.f32 %v2561_v36, %v2561_v36  ;;  %v1954_v39 = vpop.f32.mrb[9].mxu1 }
 0x1e0   :  { %v355_v40 = vadd.f32 %v354_v37, %v353_v33 }
 0x1e1   :  { %v393_v41 = vsel %vm346_vm1, %v379_v38, 0.0 }
 0x1e2   :  { %v394_v42 = vadd.f32 %v393_v41, %v392_v35  ;;  %v2568_v43 = vpop.f32.mrb[10].mxu1 }
 0x1e3   :  { %v356_v44 = vsel %vm346_vm1, %v2568_v43, 0.0  ;;  %v380_v45 = vmul.f32 %v2568_v43, %v2568_v43  ;;  %v1957_v46 = vpop.f32.mrb[11].mxu1 }
 0x1e4   :  { %v357_v47 = vadd.f32 %v356_v44, %v355_v40 }
 0x1e5   :  { %v395_v48 = vsel %vm346_vm1, %v380_v45, 0.0 }
 0x1e6   :  { %v396_v49 = vadd.f32 %v395_v48, %v394_v42  ;;  %v2575_v50 = vpop.f32.mrb[12].mxu1 }
 0x1e7   :  { %v358_v51 = vsel %vm346_vm1, %v2575_v50, 0.0  ;;  %v381_v52 = vmul.f32 %v2575_v50, %v2575_v50  ;;  %v1960_v53 = vpop.f32.mrb[13].mxu1 }
 0x1e8   :  { %v359_v54 = vadd.f32 %v358_v51, %v357_v47 }
 0x1e9   :  { %v397_v55 = vsel %vm346_vm1, %v381_v52, 0.0 }
 0x1ea   :  { %v398_v56 = vadd.f32 %v397_v55, %v396_v49  ;;  %v2582_v57 = vpop.f32.mrb[14].mxu1 }
 0x1eb   :  { %v360_v58 = vsel %vm346_vm1, %v2582_v57, 0.0  ;;  %v382_v59 = vmul.f32 %v2582_v57, %v2582_v57  ;;  %v1963_v60 = vpop.f32.mrb[15].mxu1 }
 0x1ec   :  { %v361_v61 = vadd.f32 %v360_v58, %v359_v54 }
 0x1ed   :  { %v399_v62 = vsel %vm346_vm1, %v382_v59, 0.0 }
 0x1ee   :  { %v400_v63 = vadd.f32 %v399_v62, %v398_v56  ;;  %v2589_v1 = vpop.f32.mrb[16].mxu1 }
 0x1ef   :  { %v362_v2 = vsel %vm346_vm1, %v2589_v1, 0.0  ;;  %v383_v3 = vmul.f32 %v2589_v1, %v2589_v1  ;;  %v1966_v5 = vpop.f32.mrb[17].mxu1 }
 0x1f0   :  { %v363_v6 = vadd.f32 %v362_v2, %v361_v61 }
 0x1f1   :  { %v401_v7 = vsel %vm346_vm1, %v383_v3, 0.0 }
 0x1f2   :  { %v402_v8 = vadd.f32 %v401_v7, %v400_v63  ;;  %v2596_v9 = vpop.f32.mrb[18].mxu1  ;;  %v502_v7 = vpop.permute.xlu0 %501 }
 0x1f3   :  { %v364_v11 = vsel %vm346_vm1, %v2596_v9, 0.0  ;;  %v384_v12 = vmul.f32 %v2596_v9, %v2596_v9  ;;  %v1969_v14 = vpop.f32.mrb[19].mxu1 }
 0x1f4   :  { %v365_v15 = vadd.f32 %v364_v11, %v363_v6 }
 0x1f5   :  { %v403_v16 = vsel %vm346_vm1, %v384_v12, 0.0 }
 0x1f6   :  { %v404_v17 = vadd.f32 %v403_v16, %v402_v8  ;;  %v342_v18 = vpop.f32.mrb[20].mxu1 }
 0x1f7   :  { %v366_v19 = vsel %vm346_vm1, %v342_v18, 0.0  ;;  %v385_v20 = vmul.f32 %v342_v18, %v342_v18  ;;  %v1972_v21 = vpop.f32.mrb[21].mxu1 }
 0x1f8   :  { %v367_v23 = vadd.f32 %v366_v19, %v365_v15 }
 0x1f9   :  { %v405_v24 = vsel %vm346_vm1, %v385_v20, 0.0 }
 0x1fa   :  { %v368_v25 = vrot.slane %v367_v23, 4  ;;  %v406_v26 = vadd.f32 %v405_v24, %v404_v17  ;;  %v507_v17 = vpop.permute.xlu0 %506 }
 0x1fc   :  { %v369_v27 = vadd.f32 %v368_v25, %v367_v23  ;;  %v407_v28 = vrot.slane %v406_v26, 4  ;;  %v512_v23 = vpop.permute.xlu1 %511 }
 0x1fe   :  { %v370_v30 = vrot.slane %v369_v27, 2  ;;  %v408_v31 = vadd.f32 %v407_v28, %v406_v26 }
 0x200   :  { %v371_v32 = vadd.f32 %v370_v30, %v369_v27  ;;  %v409_v33 = vrot.slane %v408_v31, 2  ;;  %v517_v28 = vpop.permute.xlu1 %516 }
 0x202   :  { %v372_v34 = vrot.slane %v371_v32, 1  ;;  %v410_v35 = vadd.f32 %v409_v33, %v408_v31 }
 0x204   :  { %v373_v37 = vadd.f32 %v372_v34, %v371_v32  ;;  %v411_v38 = vrot.slane %v410_v35, 1  ;;  %v522_v34 = vpop.permute.xlu0 %521 }
 0x206   :  { %v374_v39 = vmul.f32 0.045454547, %v373_v37  ;;  %v412_v40 = vadd.f32 %v411_v38, %v410_v35 }
 0x208   :  { %v413_v41 = vmul.f32 0.045454547, %v412_v40  ;;  %v414_v42 = vmul.f32 %v374_v39, %v374_v39  ;;  %v427_v44 = vsub.f32 %v342_v18, %v374_v39  ;;  %v417_v45 = vsub.f32 %v2533_v10, %v374_v39  ;;  %v527_v40 = vpop.permute.xlu1 %526 }
 0x209   :  { %v419_v46 = vsub.f32 %v2547_v22, %v374_v39  ;;  %v418_v47 = vsub.f32 %v2537_v13, %v374_v39  ;;  %v420_v48 = vsub.f32 %v2554_v29, %v374_v39  ;;  %v421_v49 = vsub.f32 %v2561_v36, %v374_v39  ;;  %v2618_v13 = vld [vmem:[%s2920_s5] ss:$0 sm:$0xff] }
 0x20a   :  { %v415_v51 = vsub.f32 %v413_v41, %v414_v42  ;;  %v422_v52 = vsub.f32 %v2568_v43, %v374_v39  ;;  %v423_v53 = vsub.f32 %v2575_v50, %v374_v39  ;;  %v424_v54 = vsub.f32 %v2582_v57, %v374_v39  ;;  %v2625_v57 = vld [vmem:[%s2921_s6] ss:$0 sm:$0xff] }
 0x20b   :  { %v425_v55 = vsub.f32 %v2589_v1, %v374_v39  ;;  %v426_v56 = vsub.f32 %v2596_v9, %v374_v39 }
 0x20c   :  { %v416_v10 = vmax.f32 %v415_v51, 0.0 }
 0x20e   :  { %v428_v58 = vadd.f32 1e-05, %v416_v10 }
 0x210   :  { %2184 = vrsqrt.f32 %v428_v58 }
 0x21a   :  { %v2185_v22 = vpop.eup %2184 }
 0x21b   :  { %v2620_v29 = vmul.f32 %v2185_v22, %v427_v44  ;;  %v430_v36 = vmul.f32 %v2185_v22, %v417_v45  ;;  %v432_v43 = vmul.f32 %v2185_v22, %v419_v46  ;;  %v431_v50 = vmul.f32 %v2185_v22, %v418_v47  ;;  %v532_v46 = vpop.permute.xlu0 %531 }
 0x21c   :  { %v433_v59 = vmul.f32 %v2185_v22, %v420_v48  ;;  %v434_v60 = vmul.f32 %v2185_v22, %v421_v49  ;;  %v435_v61 = vmul.f32 %v2185_v22, %v422_v52  ;;  %v436_v62 = vmul.f32 %v2185_v22, %v423_v53  ;;  %v537_v52 = vpop.permute.xlu1 %536 }
 0x21d   :  { %v448_v63 = vmul.f32 %v2618_v13, %v430_v36  ;;  %v449_v1 = vmul.f32 %v2618_v13, %v431_v50  ;;  %v437_v2 = vmul.f32 %v2185_v22, %v424_v54  ;;  %v450_v5 = vmul.f32 %v2618_v13, %v432_v43 }
 0x21e   :  { %v451_v14 = vmul.f32 %v2618_v13, %v433_v59  ;;  %v438_v15 = vmul.f32 %v2185_v22, %v425_v55  ;;  %v439_v16 = vmul.f32 %v2185_v22, %v426_v56  ;;  %v452_v21 = vmul.f32 %v2618_v13, %v434_v60 }
 0x21f   :  { %v466_v3 = vadd.f32 %v2625_v57, %v448_v63  ;;  %v467_v6 = vadd.f32 %v2625_v57, %v449_v1  ;;  %v468_v11 = vadd.f32 %v2625_v57, %v450_v5  ;;  %v453_v27 = vmul.f32 %v2618_v13, %v435_v61  ;;  %v542_v10 = vpop.permute.xlu0 %541 }
 0x220   :  { %v469_v20 = vadd.f32 %v2625_v57, %v451_v14  ;;  %v470_v26 = vadd.f32 %v2625_v57, %v452_v21  ;;  %v454_v33 = vmul.f32 %v2618_v13, %v436_v62  ;;  %v455_v39 = vmul.f32 %v2618_v13, %v437_v2  ;;  %v547_v43 = vpop.permute.xlu1 %546 }
 0x221   :  { %v477_v8 = vmax.f32 %v466_v3, 0.0  ;;  %v478_v12 = vmax.f32 %v467_v6, 0.0  ;;  %v479_v18 = vmax.f32 %v468_v11, 0.0  ;;  %v471_v32 = vadd.f32 %v2625_v57, %v453_v27 }
 0x222   :  { %v480_v25 = vmax.f32 %v469_v20, 0.0  ;;  %v481_v31 = vmax.f32 %v470_v26, 0.0  ;;  %v472_v38 = vadd.f32 %v2625_v57, %v454_v33  ;;  %v473_v44 = vadd.f32 %v2625_v57, %v455_v39 }
 0x223   :  { %v554_v9 = vmul.f32 %v502_v7, %v477_v8  ;;  %v555_v19 = vmul.f32 %v507_v17, %v478_v12  ;;  %v556_v24 = vmul.f32 %v512_v23, %v479_v18  ;;  %v482_v37 = vmax.f32 %v471_v32, 0.0  ;;  %v552_v60 = vpop.permute.xlu0 %551 }
 0x224   :  { %v557_v30 = vmul.f32 %v517_v28, %v480_v25  ;;  %v558_v35 = vmul.f32 %v522_v34, %v481_v31  ;;  %v483_v42 = vmax.f32 %v472_v38, 0.0  ;;  %v456_v45 = vmul.f32 %v2618_v13, %v438_v15 }
 0x225   :  { %1982 = vmatmul.mubr.msk.f32.vlgmr.msra.gmra.mrb[22].mxu0 %vm346_vm1, %v554_v9  ;;  %v559_v41 = vmul.f32 %v527_v40, %v482_v37  ;;  %v484_v48 = vmax.f32 %v473_v44, 0.0  ;;  %v457_v51 = vmul.f32 %v2618_v13, %v439_v16  ;;  %v458_v56 = vmul.f32 %v2618_v13, %v2620_v29  ;;  %v864_v29 = vld [vmem:[%s2922_s10] sm:$0xff] }
 0x226   :  { %1984 = vmatprep.mubr.msk.f32.mxu0 %vm2191_vm0, %v2192_v4  ;;  %v560_v47 = vmul.f32 %v532_v46, %v483_v42  ;;  %v474_v49 = vadd.f32 %v2625_v57, %v456_v45 }
 0x227   :  { %v561_v53 = vmul.f32 %v537_v52, %v484_v48  ;;  %v475_v55 = vadd.f32 %v2625_v57, %v457_v51  ;;  %v476_v36 = vadd.f32 %v2625_v57, %v458_v56  ;;  %v865_v57 = vld [vmem:[%s2922_s10 + $0x8] sm:$0xff] }
 0x228   :  { %v485_v54 = vmax.f32 %v474_v49, 0.0  ;;  %v2146_v61 = vpack.c.bf16 %v865_v57, %v864_v29 }
 0x229   :  { %1985 = vmatmul.mubr.msk.f32.gmra.mrb[24].mxu0 %vm346_vm1, %v555_v19  ;;  %v486_v22 = vmax.f32 %v475_v55, 0.0  ;;  %v487_v59 = vmax.f32 %v476_v36, 0.0 }
 0x22a   :  { %1987 = vmatprep.mubr.msk.f32.mxu0 %vm2191_vm0, %v2192_v4  ;;  %v562_v58 = vmul.f32 %v542_v10, %v485_v54  ;;  %2147 = vmatpush3.bf16.msra.mxu1 %v2146_v61 }
 0x22b   :  { %v563_v50 = vmul.f32 %v547_v43, %v486_v22  ;;  %v564_v13 = vmul.f32 %v552_v60, %v487_v59  ;;  %2148 = vmatprep.subr.bf16.mxu1 %v2190_v0 }
 0x22d   :  { %1988 = vmatmul.mubr.msk.f32.gmra.mrb[26].mxu0 %vm346_vm1, %v556_v24 }
 0x22e   :  { %1990 = vmatprep.mubr.msk.f32.mxu0 %vm2191_vm0, %v2192_v4 }
 0x231   :  { %1991 = vmatmul.mubr.msk.f32.gmra.mrb[28].mxu0 %vm346_vm1, %v557_v30 }
 0x232   :  { %1993 = vmatprep.mubr.msk.f32.mxu0 %vm2191_vm0, %v2192_v4 }
 0x235   :  { %1994 = vmatmul.mubr.msk.f32.gmra.mrb[30].mxu0 %vm346_vm1, %v558_v35 }
 0x236   :  { %1996 = vmatprep.mubr.msk.f32.mxu0 %vm2191_vm0, %v2192_v4 }
 0x239   :  { %1997 = vmatmul.mubr.msk.f32.gmra.mrb[32].mxu0 %vm346_vm1, %v559_v41 }
 0x23a   :  { %1999 = vmatprep.mubr.msk.f32.mxu0 %vm2191_vm0, %v2192_v4 }
 0x23d   :  { %2000 = vmatmul.mubr.msk.f32.gmra.mrb[34].mxu0 %vm346_vm1, %v560_v47 }
 0x23e   :  { %2002 = vmatprep.mubr.msk.f32.mxu0 %vm2191_vm0, %v2192_v4 }
 0x241   :  { %2003 = vmatmul.mubr.msk.f32.gmra.mrb[36].mxu0 %vm346_vm1, %v561_v53 }
 0x242   :  { %2005 = vmatprep.mubr.msk.f32.mxu0 %vm2191_vm0, %v2192_v4 }
 0x245   :  { %2006 = vmatmul.mubr.msk.f32.gmra.mrb[38].mxu0 %vm346_vm1, %v562_v58 }
 0x246   :  { %2008 = vmatprep.mubr.msk.f32.mxu0 %vm2191_vm0, %v2192_v4 }
 0x249   :  { %2009 = vmatmul.mubr.msk.f32.gmra.mrb[40].mxu0 %vm346_vm1, %v563_v50 }
 0x24a   :  { %2011 = vmatprep.mubr.msk.f32.mxu0 %vm2191_vm0, %v2192_v4 }
 0x24d   :  { %2012 = vmatmul.mubr.msk.f32.gmra.mrb[42].mxu0 %vm346_vm1, %v564_v13 }
 0x2f8   :  { %v2688_v62 = vpop.f32.mrb[22].mxu0 }
 0x2f9   :  { %v1983_v63 = vpop.f32.mrb[23].mxu0  ;;  %v751_v1 = vmul.f32 %v2688_v62, %v2688_v62  ;;  %v723_v3 = vsel %vm722_vm2, %v2688_v62, 0.0 }
 0x2fb   :  { %v762_v9 = vsel %vm722_vm2, %v751_v1, 0.0 }
 0x2fc   :  { %v2692_v2 = vpop.f32.mrb[24].mxu0 }
 0x2fd   :  { %v724_v5 = vsel %vm722_vm2, %v2692_v2, 0.0  ;;  %v752_v6 = vmul.f32 %v2692_v2, %v2692_v2  ;;  %v1986_v7 = vpop.f32.mrb[25].mxu0 }
 0x2fe   :  { %v725_v8 = vadd.f32 %v724_v5, %v723_v3 }
 0x2ff   :  { %v763_v11 = vsel %vm722_vm2, %v752_v6, 0.0 }
 0x300   :  { %v764_v12 = vadd.f32 %v763_v11, %v762_v9  ;;  %v2702_v14 = vpop.f32.mrb[26].mxu0 }
 0x301   :  { %v726_v15 = vsel %vm722_vm2, %v2702_v14, 0.0  ;;  %v753_v16 = vmul.f32 %v2702_v14, %v2702_v14  ;;  %v1989_v17 = vpop.f32.mrb[27].mxu0 }
 0x302   :  { %v727_v18 = vadd.f32 %v726_v15, %v725_v8 }
 0x303   :  { %v765_v19 = vsel %vm722_vm2, %v753_v16, 0.0 }
 0x304   :  { %v766_v20 = vadd.f32 %v765_v19, %v764_v12  ;;  %v2709_v21 = vpop.f32.mrb[28].mxu0 }
 0x305   :  { %v728_v23 = vsel %vm722_vm2, %v2709_v21, 0.0  ;;  %v754_v24 = vmul.f32 %v2709_v21, %v2709_v21  ;;  %v1992_v25 = vpop.f32.mrb[29].mxu0 }
 0x306   :  { %v729_v26 = vadd.f32 %v728_v23, %v727_v18 }
 0x307   :  { %v767_v27 = vsel %vm722_vm2, %v754_v24, 0.0 }
 0x308   :  { %v768_v28 = vadd.f32 %v767_v27, %v766_v20  ;;  %v2716_v30 = vpop.f32.mrb[30].mxu0 }
 0x309   :  { %v730_v31 = vsel %vm722_vm2, %v2716_v30, 0.0  ;;  %v755_v32 = vmul.f32 %v2716_v30, %v2716_v30  ;;  %v1995_v33 = vpop.f32.mrb[31].mxu0 }
 0x30a   :  { %v731_v34 = vadd.f32 %v730_v31, %v729_v26 }
 0x30b   :  { %v769_v35 = vsel %vm722_vm2, %v755_v32, 0.0 }
 0x30c   :  { %v770_v37 = vadd.f32 %v769_v35, %v768_v28  ;;  %v2723_v38 = vpop.f32.mrb[32].mxu0 }
 0x30d   :  { %v732_v39 = vsel %vm722_vm2, %v2723_v38, 0.0  ;;  %v756_v40 = vmul.f32 %v2723_v38, %v2723_v38  ;;  %v1998_v41 = vpop.f32.mrb[33].mxu0 }
 0x30e   :  { %v733_v42 = vadd.f32 %v732_v39, %v731_v34 }
 0x30f   :  { %v771_v44 = vsel %vm722_vm2, %v756_v40, 0.0 }
 0x310   :  { %v772_v45 = vadd.f32 %v771_v44, %v770_v37  ;;  %v2730_v46 = vpop.f32.mrb[34].mxu0 }
 0x311   :  { %v734_v47 = vsel %vm722_vm2, %v2730_v46, 0.0  ;;  %v757_v48 = vmul.f32 %v2730_v46, %v2730_v46  ;;  %v2001_v49 = vpop.f32.mrb[35].mxu0 }
 0x312   :  { %v735_v51 = vadd.f32 %v734_v47, %v733_v42 }
 0x313   :  { %v773_v52 = vsel %vm722_vm2, %v757_v48, 0.0 }
 0x314   :  { %v774_v53 = vadd.f32 %v773_v52, %v772_v45  ;;  %v2737_v54 = vpop.f32.mrb[36].mxu0 }
 0x315   :  { %v736_v55 = vsel %vm722_vm2, %v2737_v54, 0.0  ;;  %v758_v56 = vmul.f32 %v2737_v54, %v2737_v54  ;;  %v2004_v10 = vpop.f32.mrb[37].mxu0 }
 0x316   :  { %v737_v58 = vadd.f32 %v736_v55, %v735_v51 }
 0x317   :  { %v775_v22 = vsel %vm722_vm2, %v758_v56, 0.0 }
 0x318   :  { %v776_v36 = vadd.f32 %v775_v22, %v774_v53  ;;  %v2744_v43 = vpop.f32.mrb[38].mxu0 }
 0x319   :  { %v738_v50 = vsel %vm722_vm2, %v2744_v43, 0.0  ;;  %v759_v59 = vmul.f32 %v2744_v43, %v2744_v43  ;;  %v2007_v60 = vpop.f32.mrb[39].mxu0 }
 0x31a   :  { %v739_v13 = vadd.f32 %v738_v50, %v737_v58  ;;  %v867_v50 = vld [vmem:[%s2922_s10 + $0x18] sm:$0xff] }
 0x31b   :  { %v777_v29 = vsel %vm722_vm2, %v759_v59, 0.0 }
 0x31c   :  { %v778_v57 = vadd.f32 %v777_v29, %v776_v36  ;;  %v2751_v61 = vpop.f32.mrb[40].mxu0 }
 0x31d   :  { %v740_v63 = vsel %vm722_vm2, %v2751_v61, 0.0  ;;  %v760_v1 = vmul.f32 %v2751_v61, %v2751_v61  ;;  %v2010_v3 = vpop.f32.mrb[41].mxu0 }
 0x31e   :  { %v741_v5 = vadd.f32 %v740_v63, %v739_v13  ;;  %v869_v63 = vld [vmem:[%s2922_s10 + $0x28] sm:$0xff] }
 0x31f   :  { %v779_v6 = vsel %vm722_vm2, %v760_v1, 0.0 }
 0x320   :  { %v780_v7 = vadd.f32 %v779_v6, %v778_v57  ;;  %v718_v8 = vpop.f32.mrb[42].mxu0 }
 0x321   :  { %v742_v9 = vsel %vm722_vm2, %v718_v8, 0.0  ;;  %v761_v11 = vmul.f32 %v718_v8, %v718_v8  ;;  %v2013_v12 = vpop.f32.mrb[43].mxu0 }
 0x322   :  { %v743_v15 = vadd.f32 %v742_v9, %v741_v5  ;;  %v871_v12 = vld [vmem:[%s2922_s10 + $0x38] sm:$0xff] }
 0x323   :  { %v781_v16 = vsel %vm722_vm2, %v761_v11, 0.0  ;;  %v870_v11 = vld [vmem:[%s2922_s10 + $0x30] sm:$0xff] }
 0x324   :  { %v744_v17 = vrot.slane %v743_v15, 4  ;;  %v782_v18 = vadd.f32 %v781_v16, %v780_v7  ;;  %v2155_v16 = vpack.c.bf16 %v871_v12, %v870_v11 }
 0x326   :  { %v745_v19 = vadd.f32 %v744_v17, %v743_v15  ;;  %v783_v20 = vrot.slane %v782_v18, 4 }
 0x328   :  { %v746_v23 = vrot.slane %v745_v19, 2  ;;  %v784_v24 = vadd.f32 %v783_v20, %v782_v18  ;;  %v873_v20 = vld [vmem:[%s2922_s10 + $0x48] sm:$0xff] }
 0x32a   :  { %v747_v25 = vadd.f32 %v746_v23, %v745_v19  ;;  %v785_v26 = vrot.slane %v784_v24, 2  ;;  %v872_v19 = vld [vmem:[%s2922_s10 + $0x40] sm:$0xff] }
 0x32c   :  { %v748_v27 = vrot.slane %v747_v25, 1  ;;  %v786_v28 = vadd.f32 %v785_v26, %v784_v24  ;;  %v2158_v24 = vpack.c.bf16 %v873_v20, %v872_v19 }
 0x32e   :  { %v749_v31 = vadd.f32 %v748_v27, %v747_v25  ;;  %v787_v32 = vrot.slane %v786_v28, 1  ;;  %v874_v27 = vld [vmem:[%s2922_s10 + $0x50] sm:$0xff] }
 0x330   :  { %v750_v33 = vmul.f32 0.045454547, %v749_v31  ;;  %v788_v34 = vadd.f32 %v787_v32, %v786_v28  ;;  %v875_v28 = vld [vmem:[%s2922_s10 + $0x58] sm:$0xff] }
 0x331   :  { %v2161_v32 = vpack.c.bf16 %v875_v28, %v874_v27 }
 0x332   :  { %v789_v35 = vmul.f32 0.045454547, %v788_v34  ;;  %v790_v37 = vmul.f32 %v750_v33, %v750_v33  ;;  %v803_v39 = vsub.f32 %v718_v8, %v750_v33  ;;  %v793_v40 = vsub.f32 %v2688_v62, %v750_v33 }
 0x333   :  { %v794_v41 = vsub.f32 %v2692_v2, %v750_v33  ;;  %v795_v42 = vsub.f32 %v2702_v14, %v750_v33  ;;  %v796_v44 = vsub.f32 %v2709_v21, %v750_v33  ;;  %v797_v45 = vsub.f32 %v2716_v30, %v750_v33  ;;  %v2773_v14 = vld [vmem:[%s2923_s8] ss:$0 sm:$0xff] }
 0x334   :  { %v791_v47 = vsub.f32 %v789_v35, %v790_v37  ;;  %v798_v48 = vsub.f32 %v2723_v38, %v750_v33  ;;  %v799_v49 = vsub.f32 %v2730_v46, %v750_v33  ;;  %v800_v51 = vsub.f32 %v2737_v54, %v750_v33  ;;  %v2780_v54 = vld [vmem:[%s2924_s9] ss:$0 sm:$0xff]  ;;  %v877_v37 = vld [vmem:[%s2922_s10 + $0x68] sm:$0xff] }
 0x335   :  { %v801_v52 = vsub.f32 %v2744_v43, %v750_v33  ;;  %v802_v53 = vsub.f32 %v2751_v61, %v750_v33  ;;  %v866_v43 = vld [vmem:[%s2922_s10 + $0x10] sm:$0xff]  ;;  %v868_v61 = vld [vmem:[%s2922_s10 + $0x20] sm:$0xff] }
 0x336   :  { %v792_v62 = vmax.f32 %v791_v47, 0.0  ;;  %v2149_v13 = vpack.c.bf16 %v867_v50, %v866_v43  ;;  %v2152_v7 = vpack.c.bf16 %v869_v63, %v868_v61  ;;  %v876_v35 = vld [vmem:[%s2922_s10 + $0x60] sm:$0xff]  ;;  %v885_v50 = vld [vmem:[%s2922_s10 + $0xa8] sm:$0xff] }
 0x337   :  { %v884_v43 = vld [vmem:[%s2922_s10 + $0xa0] sm:$0xff] }
 0x338   :  { %v804_v55 = vadd.f32 1e-05, %v792_v62 }
 0x33a   :  { %2186 = vrsqrt.f32 %v804_v55 }
 0x344   :  { %v2187_v2 = vpop.eup %2186 }
 0x345   :  { %v2775_v21 = vmul.f32 %v2187_v2, %v803_v39  ;;  %v806_v30 = vmul.f32 %v2187_v2, %v793_v40  ;;  %v807_v38 = vmul.f32 %v2187_v2, %v794_v41  ;;  %v808_v46 = vmul.f32 %v2187_v2, %v795_v42 }
 0x346   :  { %v809_v56 = vmul.f32 %v2187_v2, %v796_v44  ;;  %v810_v10 = vmul.f32 %v2187_v2, %v797_v45  ;;  %v811_v58 = vmul.f32 %v2187_v2, %v798_v48  ;;  %v812_v22 = vmul.f32 %v2187_v2, %v799_v49  ;;  %v878_v44 = vld [vmem:[%s2922_s10 + $0x70] sm:$0xff]  ;;  %v879_v45 = vld [vmem:[%s2922_s10 + $0x78] sm:$0xff] }
 0x347   :  { %v824_v36 = vmul.f32 %v2773_v14, %v806_v30  ;;  %v825_v59 = vmul.f32 %v2773_v14, %v807_v38  ;;  %v826_v1 = vmul.f32 %v2773_v14, %v808_v46  ;;  %v813_v3 = vmul.f32 %v2187_v2, %v800_v51  ;;  %v882_v38 = vld [vmem:[%s2922_s10 + $0x90] sm:$0xff]  ;;  %v883_v46 = vld [vmem:[%s2922_s10 + $0x98] sm:$0xff] }
 0x348   :  { %v814_v5 = vmul.f32 %v2187_v2, %v801_v52  ;;  %v2800_v6 = vmul.f32 %v2187_v2, %v802_v53  ;;  %v827_v15 = vmul.f32 %v2773_v14, %v809_v56  ;;  %v828_v23 = vmul.f32 %v2773_v14, %v810_v10  ;;  %v880_v52 = vld [vmem:[%s2922_s10 + $0x80] sm:$0xff]  ;;  %v881_v53 = vld [vmem:[%s2922_s10 + $0x88] sm:$0xff] }
 0x349   :  { %v842_v60 = vadd.f32 %v2780_v54, %v824_v36  ;;  %v843_v57 = vadd.f32 %v2780_v54, %v825_v59  ;;  %v844_v9 = vadd.f32 %v2780_v54, %v826_v1  ;;  %v829_v31 = vmul.f32 %v2773_v14, %v811_v58 }
 0x34a   :  { %v845_v18 = vadd.f32 %v2780_v54, %v827_v15  ;;  %v846_v26 = vadd.f32 %v2780_v54, %v828_v23  ;;  %v830_v39 = vmul.f32 %v2773_v14, %v812_v22  ;;  %v2164_v40 = vpack.c.bf16 %v877_v37, %v876_v35 }
 0x34b   :  { %v853_v29 = vmax.f32 %v842_v60, 0.0  ;;  %v854_v8 = vmax.f32 %v843_v57, 0.0  ;;  %v855_v17 = vmax.f32 %v844_v9, 0.0  ;;  %v847_v34 = vadd.f32 %v2780_v54, %v829_v31 }
 0x34c   :  { %v856_v25 = vmax.f32 %v845_v18, 0.0  ;;  %v857_v33 = vmax.f32 %v846_v26, 0.0  ;;  %v848_v42 = vadd.f32 %v2780_v54, %v830_v39  ;;  %v831_v47 = vmul.f32 %v2773_v14, %v813_v3 }
 0x34d   :  { %2019 = vmatmul.mubr.msk.f32.vlgmr.msra.gmra.mrb[22].mxu1 %vm722_vm2, %v853_v29  ;;  %v858_v41 = vmax.f32 %v847_v34, 0.0  ;;  %v2167_v48 = vpack.c.bf16 %v879_v45, %v878_v44  ;;  %v832_v62 = vmul.f32 %v2773_v14, %v814_v5  ;;  %v2170_v55 = vpack.c.bf16 %v881_v53, %v880_v52 }
 0x34e   :  { %2150 = vmatpush3.bf16.msra.mxu1 %v2149_v13  ;;  %2025 = vmatprep.mubr.msk.f32.mxu1 %vm2191_vm0, %v2192_v4  ;;  %v859_v49 = vmax.f32 %v848_v42, 0.0  ;;  %v849_v51 = vadd.f32 %v2780_v54, %v831_v47  ;;  %v833_v56 = vmul.f32 %v2773_v14, %v2800_v6  ;;  %v2173_v10 = vpack.c.bf16 %v883_v46, %v882_v38 }
 0x34f   :  { %2151 = vmatprep.subr.bf16.mxu1 %v2190_v0  ;;  %v850_v30 = vadd.f32 %v2780_v54, %v832_v62  ;;  %v834_v58 = vmul.f32 %v2773_v14, %v2775_v21  ;;  %v2176_v14 = vpack.c.bf16 %v885_v50, %v884_v43 }
 0x350   :  { %v860_v2 = vmax.f32 %v849_v51, 0.0  ;;  %v851_v36 = vadd.f32 %v2780_v54, %v833_v56 }
 0x351   :  { %2026 = vmatmul.mubr.msk.f32.vlgmr.msra.gmra.mrb[24].mxu1 %vm722_vm2, %v854_v8  ;;  %v861_v22 = vmax.f32 %v850_v30, 0.0  ;;  %v852_v21 = vadd.f32 %v2780_v54, %v834_v58 }
 0x352   :  { %2153 = vmatpush3.bf16.msra.mxu1 %v2152_v7  ;;  %2032 = vmatprep.mubr.msk.f32.mxu1 %vm2191_vm0, %v2192_v4  ;;  %v862_v59 = vmax.f32 %v851_v36, 0.0 }
 0x353   :  { %2154 = vmatprep.subr.bf16.mxu1 %v2190_v0  ;;  %v863_v60 = vmax.f32 %v852_v21, 0.0 }
 0x355   :  { %2033 = vmatmul.mubr.msk.f32.vlgmr.msra.gmra.mrb[26].mxu1 %vm722_vm2, %v855_v17 }
 0x356   :  { %2156 = vmatpush3.bf16.msra.mxu1 %v2155_v16  ;;  %2039 = vmatprep.mubr.msk.f32.mxu1 %vm2191_vm0, %v2192_v4 }
 0x357   :  { %2157 = vmatprep.subr.bf16.mxu1 %v2190_v0 }
 0x359   :  { %2040 = vmatmul.mubr.msk.f32.vlgmr.msra.gmra.mrb[28].mxu1 %vm722_vm2, %v856_v25 }
 0x35a   :  { %2159 = vmatpush3.bf16.msra.mxu1 %v2158_v24  ;;  %2046 = vmatprep.mubr.msk.f32.mxu1 %vm2191_vm0, %v2192_v4 }
 0x35b   :  { %2160 = vmatprep.subr.bf16.mxu1 %v2190_v0 }
 0x35d   :  { %2047 = vmatmul.mubr.msk.f32.vlgmr.msra.gmra.mrb[30].mxu1 %vm722_vm2, %v857_v33 }
 0x35e   :  { %2162 = vmatpush3.bf16.msra.mxu1 %v2161_v32  ;;  %2053 = vmatprep.mubr.msk.f32.mxu1 %vm2191_vm0, %v2192_v4  ;;  %v1740_v32 = vld [vmem:[%s2925_s11] ss:$0 sm:$0xff] }
 0x35f   :  { %2163 = vmatprep.subr.bf16.mxu1 %v2190_v0 }
 0x361   :  { %2054 = vmatmul.mubr.msk.f32.vlgmr.msra.gmra.mrb[32].mxu1 %vm722_vm2, %v858_v41 }
 0x362   :  { %2165 = vmatpush3.bf16.msra.mxu1 %v2164_v40  ;;  %2060 = vmatprep.mubr.msk.f32.mxu1 %vm2191_vm0, %v2192_v4 }
 0x363   :  { %2166 = vmatprep.subr.bf16.mxu1 %v2190_v0 }
 0x365   :  { %2061 = vmatmul.mubr.msk.f32.vlgmr.msra.gmra.mrb[34].mxu1 %vm722_vm2, %v859_v49 }
 0x366   :  { %2168 = vmatpush3.bf16.msra.mxu1 %v2167_v48  ;;  %2067 = vmatprep.mubr.msk.f32.mxu1 %vm2191_vm0, %v2192_v4 }
 0x367   :  { %2169 = vmatprep.subr.bf16.mxu1 %v2190_v0 }
 0x369   :  { %2068 = vmatmul.mubr.msk.f32.vlgmr.msra.gmra.mrb[36].mxu1 %vm722_vm2, %v860_v2 }
 0x36a   :  { %2171 = vmatpush3.bf16.msra.mxu1 %v2170_v55  ;;  %2074 = vmatprep.mubr.msk.f32.mxu1 %vm2191_vm0, %v2192_v4 }
 0x36b   :  { %2172 = vmatprep.subr.bf16.mxu1 %v2190_v0 }
 0x36d   :  { %2075 = vmatmul.mubr.msk.f32.vlgmr.msra.gmra.mrb[38].mxu1 %vm722_vm2, %v861_v22 }
 0x36e   :  { %2174 = vmatpush3.bf16.msra.mxu1 %v2173_v10  ;;  %2081 = vmatprep.mubr.msk.f32.mxu1 %vm2191_vm0, %v2192_v4 }
 0x36f   :  { %2175 = vmatprep.subr.bf16.mxu1 %v2190_v0 }
 0x371   :  { %2082 = vmatmul.mubr.msk.f32.vlgmr.msra.gmra.mrb[40].mxu1 %vm722_vm2, %v862_v59 }
 0x372   :  { %2177 = vmatpush3.bf16.msra.mxu1 %v2176_v14  ;;  %2088 = vmatprep.mubr.msk.f32.mxu1 %vm2191_vm0, %v2192_v4 }
 0x375   :  { %2089 = vmatmul.mubr.msk.f32.vlgmr.msra.gmra.mrb[42].mxu1 %vm722_vm2, %v863_v60 }
 0x420   :  { %v955_v13 = vpop.f32.mrb[22].mxu1 }
 0x421   :  { %v2020_v29 = vpop.f32.mrb[23].mxu1 }
 0x424   :  { %v1028_v57 = vpop.f32.mrb[24].mxu1 }
 0x425   :  { %v1689_v61 = vadd.f32 %v1028_v57, %v955_v13  ;;  %v2027_v63 = vpop.f32.mrb[25].mxu1 }
 0x428   :  { %v1101_v1 = vpop.f32.mrb[26].mxu1 }
 0x429   :  { %v1690_v3 = vadd.f32 %v1689_v61, %v1101_v1  ;;  %v2034_v54 = vpop.f32.mrb[27].mxu1 }
 0x42c   :  { %v1174_v5 = vpop.f32.mrb[28].mxu1 }
 0x42d   :  { %v1691_v0 = vadd.f32 %v1690_v3, %v1174_v5  ;;  %v2041_v6 = vpop.f32.mrb[29].mxu1 }
 0x430   :  { %v1247_v7 = vpop.f32.mrb[30].mxu1 }
 0x431   :  { %v1692_v8 = vadd.f32 %v1691_v0, %v1247_v7  ;;  %v2048_v9 = vpop.f32.mrb[31].mxu1 }
 0x434   :  { %v1320_v11 = vpop.f32.mrb[32].mxu1 }
 0x435   :  { %v1693_v12 = vadd.f32 %v1692_v8, %v1320_v11  ;;  %v2055_v4 = vpop.f32.mrb[33].mxu1 }
 0x438   :  { %v1393_v15 = vpop.f32.mrb[34].mxu1 }
 0x439   :  { %v1694_v16 = vadd.f32 %v1693_v12, %v1393_v15  ;;  %v2062_v17 = vpop.f32.mrb[35].mxu1 }
 0x43c   :  { %v1466_v18 = vpop.f32.mrb[36].mxu1 }
 0x43d   :  { %v1695_v19 = vadd.f32 %v1694_v16, %v1466_v18  ;;  %v2069_v20 = vpop.f32.mrb[37].mxu1 }
 0x440   :  { %v1539_v23 = vpop.f32.mrb[38].mxu1 }
 0x441   :  { %v1696_v24 = vadd.f32 %v1695_v19, %v1539_v23  ;;  %v2076_v25 = vpop.f32.mrb[39].mxu1 }
 0x444   :  { %v1612_v26 = vpop.f32.mrb[40].mxu1 }
 0x445   :  { %v1697_v27 = vadd.f32 %v1696_v24, %v1612_v26  ;;  %v2083_v28 = vpop.f32.mrb[41].mxu1 }
 0x448   :  { %v1685_v31 = vpop.f32.mrb[42].mxu1 }
 0x449   :  { %v1698_v33 = vadd.f32 %v1697_v27, %v1685_v31  ;;  %v2090_v34 = vpop.f32.mrb[43].mxu1 }
 0x44b   :  { %v1706_v35 = vadd.f32 %v1740_v32, %v1698_v33 }
 0x44d   :  { %2188 = vtanh.f32 %v1706_v35 }
 0x457   :  { %v2189_v37 = vpop.eup %2188 }
 0x458   :  { %v1708_v39 = vmul.f32 0.5, %v2189_v37 }
 0x45a   :  { %1709 = vst [vmem:[%s2926_s12] sm:$0xff] %v1708_v39 }

</bundles_post_ra>
